<compile_context>
chip_gen: v5e
topology: v5e:2x2
jax: 0.10.0
libtpu: 0.0.40
codegen_flags: <defaults>
</compile_context>

<pallas_src>
import jax
import jax.numpy as jnp
from jax.experimental import pallas as pl
from jax.experimental.pallas import tpu as pltpu

CLAMP_MIN = 0.75   # torch.tensor(0.75) in the reference module
CLAMP_MAX = 0.02   # python float 0.02 in the reference module

LANES = 128
ROWS_PER_BLOCK = 512          # gridded path: (512, 1024) f32 = 2 MiB per block


def _cdiv(a, b):
    return -(-a // b)


def linear_clamp_kernel(p_ref, x_ref, o_ref):
    # p_ref: (2,) in SMEM -> [weight, bias] scalars.  Pure VPU work.
    w = p_ref[0]
    b = p_ref[1]
    v1 = x_ref[...] * w + b
    # torch.clamp_min then torch.clamp_max, in that exact order.
    v2 = jnp.maximum(v1, CLAMP_MIN)
    v3 = jnp.minimum(v2, CLAMP_MAX)
    o_ref[...] = v3.astype(o_ref.dtype)


def model_forward(x, w, b):
    """x: (B, 1), w: (1, 1) PyTorch-layout, b: (1,) -> (B, 1)."""
    B, in_f = x.shape
    out_f = w.shape[0]
    assert in_f == 1 and out_f == 1, "kernel is specialized for Linear(1, 1)"
    dtype = x.dtype
    itemsize = jnp.dtype(dtype).itemsize

    # Pack the two scalar parameters into a single SMEM array.
    params = jnp.concatenate([jnp.ravel(w), jnp.ravel(b)]).astype(dtype)

    # ---- Lane-dense re-presentation of the (B, 1) tensor -------------------
    n = B * in_f
    W = 1024 if n >= 1024 else LANES          # last dim: large multiple of 128
    rows = _cdiv(n, W)

    if rows <= ROWS_PER_BLOCK:
        # Small: one un-gridded block (<= 2 MiB), no pipeline overhead.
        tile_rows = rows
        grid_steps = 1
        rows_pad = rows
    else:
        tile_rows = ROWS_PER_BLOCK
        grid_steps = _cdiv(rows, tile_rows)
        rows_pad = grid_steps * tile_rows

    n_pad = rows_pad * W
    x_flat = jnp.ravel(x)
    if n_pad != n:
        x_flat = jnp.pad(x_flat, (0, n_pad - n))
    x2d = x_flat.reshape(rows_pad, W)

    cost = pl.CostEstimate(
        flops=2 * n_pad,
        transcendentals=0,
        bytes_accessed=2 * n_pad * itemsize + 2 * itemsize,
    )

    if grid_steps == 1:
        out2d = pl.pallas_call(
            linear_clamp_kernel,
            out_shape=jax.ShapeDtypeStruct((rows_pad, W), dtype),
            in_specs=[
                pl.BlockSpec(memory_space=pltpu.MemorySpace.SMEM),   # params
                pl.BlockSpec(memory_space=pltpu.MemorySpace.VMEM),   # x slab
            ],
            out_specs=pl.BlockSpec(memory_space=pltpu.MemorySpace.VMEM),
            cost_estimate=cost,
        )(params, x2d)
    else:
        out2d = pl.pallas_call(
            linear_clamp_kernel,
            out_shape=jax.ShapeDtypeStruct((rows_pad, W), dtype),
            grid=(grid_steps,),
            in_specs=[
                pl.BlockSpec(memory_space=pltpu.MemorySpace.SMEM),   # params
                pl.BlockSpec((tile_rows, W), lambda i: (i, 0)),      # x tile
            ],
            out_specs=pl.BlockSpec((tile_rows, W), lambda i: (i, 0)),
            compiler_params=pltpu.CompilerParams(
                dimension_semantics=("parallel",)),
            cost_estimate=cost,
        )(params, x2d)

    # Undo padding / lane-dense reshape.
    return out2d.reshape(-1)[:n].reshape(B, out_f)


if __name__ == "__main__":
    key = jax.random.PRNGKey(0)
    kx, kw, kb = jax.random.split(key, 3)

    # Module implies x of shape (N, 1) with Linear(1, 1); use a small batch.
    B = 8
    x1 = jax.random.normal(kx, (B, 1), dtype=jnp.float32)
    # Deterministic nn.Linear-like init (uniform in [-1, 1] for fan_in=1).
    w = jax.random.uniform(kw, (1, 1), dtype=jnp.float32, minval=-1.0, maxval=1.0)
    b = jax.random.uniform(kb, (1,), dtype=jnp.float32, minval=-1.0, maxval=1.0)

    out = jax.block_until_ready(model_forward(x1, w, b))

    # Reference check in plain JAX (exact PyTorch forward semantics).
    ref = jnp.minimum(jnp.maximum(x1 @ w.T + b[None, :], CLAMP_MIN), CLAMP_MAX)
    assert out.shape == (B, 1)
    assert jnp.allclose(out, ref, atol=1e-6), (out, ref)

    print("KERNEL_OK")
</pallas_src>

<mosaic_0001>
module attributes {stable_mosaic.version = 11 : i64} {
  func.func @linear_clamp_kernel(%arg0: memref<2xf32, #tpu.memory_space<smem>>, %arg1: memref<1x128xf32, #tpu.memory_space<vmem>>, %arg2: memref<1x128xf32, #tpu.memory_space<vmem>>) attributes {dimension_semantics = [], scalar_prefetch = 0 : i64, scratch_operands = 0 : i64, tpu.core_type = #tpu.core_type<tc>} {
    %c0 = arith.constant 0 : index
    %0 = memref.load %arg0[%c0] : memref<2xf32, #tpu.memory_space<smem>>
    %c1 = arith.constant 1 : index
    %1 = memref.load %arg0[%c1] : memref<2xf32, #tpu.memory_space<smem>>
    %c0_0 = arith.constant 0 : index
    %c0_1 = arith.constant 0 : index
    %2 = vector.load %arg1[%c0_0, %c0_1] : memref<1x128xf32, #tpu.memory_space<vmem>>, vector<1x128xf32>
    %3 = vector.broadcast %0 : f32 to vector<1x128xf32>
    %4 = arith.mulf %2, %3 : vector<1x128xf32>
    %5 = vector.broadcast %1 : f32 to vector<1x128xf32>
    %6 = arith.addf %4, %5 : vector<1x128xf32>
    %cst = arith.constant 7.500000e-01 : f32
    %7 = vector.broadcast %cst : f32 to vector<1x128xf32>
    %8 = arith.maximumf %6, %7 : vector<1x128xf32>
    %cst_2 = arith.constant 2.000000e-02 : f32
    %9 = vector.broadcast %cst_2 : f32 to vector<1x128xf32>
    %10 = arith.minimumf %8, %9 : vector<1x128xf32>
    %c0_3 = arith.constant 0 : index
    %c0_4 = arith.constant 0 : index
    %11 = vector.load %arg2[%c0_3, %c0_4] : memref<1x128xf32, #tpu.memory_space<vmem>>, vector<1x128xf32>
    tpu.vector_store %arg2[%c0_3, %c0_4], %10 {strides = array<i32>} : memref<1x128xf32, #tpu.memory_space<vmem>>, vector<1x128xf32>,
    return
  }
}

</mosaic_0001>

<bundles_post_ra>
// kernel: tpu_custom_call.1
= control target key start
LH: loop header
LB: loop body
LE: loop exit
PB: predicated region body
PF: predicated region fallthrough
CT: control target
= control target key end

     0   :  { %7 = vsyncpa [#allocation5], 0  ;;  %s164_s0 = inlined_call_operand.hbm [shape: f32[2], index: 0, kind: input, shape index: {}]   ;;  %s165_s1 = inlined_call_operand.hbm [shape: f32[1,128], index: 1, kind: input, shape index: {}]   ;;  %s166_s2 = inlined_call_operand.hbm [shape: f32[1,128], index: 2, kind: output, shape index: {}]  }
   0x1   :  { %8 = vsyncpa [#allocation3], 0 }
   0x2   :  { %9 = vsyncpa [#allocation4], 0  ;;  %s15_s11 = sshll.u32 %s164_s0, 4  ;;  %s24_s14 = sshll.u32 %s165_s1, 4  ;;  %s16_s11 = int_to_ptr.hbm [resolvable:$true] %s15_s11  ;;  %s25_s14 = int_to_ptr.hbm [resolvable:$true] %s24_s14 }
   0x3   :  { %s137_s15 = smov [#allocation2]   ;;  %s138_s16 = smov [#allocation6]  }
   0x4   :  { %18 = dma.hbm_to_smem %s16_s11, 16, %s137_s15, [#allocation5]  }
   0x5   :  { %s26_s17 = sshll.u32 %s138_s16, 4  ;;  %s27_s17 = int_to_ptr.vmem [resolvable:$true] %s26_s17 }
   0x6   :  { %29 = dma.hbm_to_vmem [thread:$0]  %s25_s14, 16, %s27_s17, [#allocation3]  }
   0x7   :  { %131 = dma.done.wait [#allocation5], 16  }
   0x8   :  { %132 = vsyncadd [#allocation5], 4294967280 }
   0x9   :  { %133 = dma.done.wait [#allocation3], 16  }
   0xa   :  { %134 = vsyncadd [#allocation3], 4294967280 }
   0xb   :  { %38 = sfence }
   0xc   :  { %s39_s18 = sld [smem:[#allocation2]]  ;;  %v41_v0 = vld [vmem:[#allocation6] sm:$0x1]  ;;  %s139_s0 = smov [#allocation7]  }
   0xd   :  { %s67_s19 = sld [smem:[#allocation2 + $0x1]]  ;;  %s54_s1 = sshll.u32 %s139_s0, 4  ;;  %s55_s1 = int_to_ptr.vmem [resolvable:$true] %s54_s1 }
   0xe   :  { %s56_s22 = sshll.u32 %s166_s2, 4  ;;  %s57_s22 = int_to_ptr.hbm [resolvable:$true] %s56_s22 }
  0x12   :  { %v42_v1 = vstv %s39_s18 }
  0x13   :  { %v43_v2 = vmul.f32 %v42_v1, %v41_v0  ;;  %v44_v3 = vstv %s67_s19 }
  0x15   :  { %v45_v4 = vadd.f32 %v44_v3, %v43_v2 }
  0x17   :  { %v46_v5 = vmax.f32 %v45_v4, 0.75 }
  0x19   :  { %v47_v6 = vmin.f32 %v46_v5, 0.02 }
  0x1b   :  { %48 = vst [vmem:[#allocation7] sm:$0x1] %v47_v6 }
  0x1c   :  { %59 = dma.vmem_to_hbm [thread:$0]  %s55_s1, 16, %s57_s22, [#allocation4]  }
  0x1d   :  { %135 = dma.done.wait [#allocation4], 16  }
  0x1e   :  { %136 = vsyncadd [#allocation4], 4294967280 }
  0x1f   :  { %64 = vsyncpa [#allocation3], 1 }
  0x20   :  { %65 = vsyncpa [#allocation4], 1 }
  0x21   :  { %66 = vsyncpa [#allocation5], 1 }

</bundles_post_ra>
